<compile_context>
chip_gen: v7x
topology: tpu7x:2x2x1
jax: 0.10.0
libtpu: 0.0.40
codegen_flags: <defaults>
</compile_context>

<pallas_src>
import jax
import jax.numpy as jnp
from jax.experimental import pallas as pl
from jax.experimental.pallas import tpu as pltpu

IN_DIM = 768
HID_DIM = 256
OUT_DIM = 24
_GRID_MIN_BATCH = 256                 # below this: single gridless invocation
_HIGHEST = jax.lax.Precision.HIGHEST  # used only in host-side fold / reference


def fused_linear_kernel(x_ref, w_hi_ref, w_lo_ref, b_ref, o_ref):
    """y = x @ W_f + b_f with f32 accumulation, output written as (tb, 24).

    W_f is carried as a bf16 hi/lo split (W_f ~= w_hi + w_lo).
      * f32 x : 3-pass compensated bf16 matmul (~Precision.HIGH accuracy,
                half the MXU passes of f32 HIGHEST emulation).
      * bf16 x: 2-pass matmul at full weight precision (use when the
                upstream producer already emits bf16 activations).
    Bias add stays in f32 (v5e has no bf16 VPU path).
    """
    w_hi = w_hi_ref[...]
    w_lo = w_lo_ref[...]
    if x_ref.dtype == jnp.float32:
        x = x_ref[...]
        x_hi = x.astype(jnp.bfloat16)
        x_lo = (x - x_hi.astype(jnp.float32)).astype(jnp.bfloat16)
        y = jnp.dot(x_hi, w_hi, preferred_element_type=jnp.float32)
        y = y + jnp.dot(x_lo, w_hi, preferred_element_type=jnp.float32)
        y = y + jnp.dot(x_hi, w_lo, preferred_element_type=jnp.float32)
    else:
        x = x_ref[...]
        y = jnp.dot(x, w_hi, preferred_element_type=jnp.float32)
        y = y + jnp.dot(x, w_lo, preferred_element_type=jnp.float32)
    o_ref[...] = (y + b_ref[...]).astype(o_ref.dtype)


def fuse_params(w1, b1, w2, b2):
    """Fold fc1/fc2 into one (768, 24) linear.  Call ONCE at init (hoisted out
    of the per-call path).  The fused weight is returned as a bf16 hi/lo split
    so the kernel can run MXU-native bf16 passes at ~f32 accuracy."""
    w1 = w1.astype(jnp.float32)
    w2 = w2.astype(jnp.float32)
    w_f = jnp.dot(w1, w2, precision=_HIGHEST)                              # (768, 24)
    b_f = jnp.dot(b1.astype(jnp.float32), w2, precision=_HIGHEST) \
        + b2.astype(jnp.float32)                                           # (1, 24)
    w_hi = w_f.astype(jnp.bfloat16)
    w_lo = (w_f - w_hi.astype(jnp.float32)).astype(jnp.bfloat16)
    return w_hi, w_lo, b_f


def _choose_batch_tile(batch, tb):
    """None -> gridless path.  Otherwise a 128-multiple tile giving >= 2 grid
    steps (so both v7x TensorCores get work), capped at tb."""
    if batch < _GRID_MIN_BATCH:
        return None
    half = max(128, ((batch // 2) // 128) * 128)
    return min(tb, half)


def net_forward(x, fused_params, *, tb=1024):
    """Forward pass of `Net`: x (B, 768) -> (B, 24) float32.

    fused_params: output of fuse_params() (precomputed once at init).
    x dtype: float32 (exact path) or bfloat16 (only when the upstream producer
        already emits bf16 -- halves the dominant HBM stream).
    tb: max batch tile (multiple of 128).  At 1024 the double-buffered f32 x
        stream is ~6 MiB, well inside scoped VMEM on v5e / v6e / v7x.
    """
    w_hi, w_lo, b_f = fused_params
    B = x.shape[0]

    cost = pl.CostEstimate(
        flops=2 * B * IN_DIM * OUT_DIM,
        transcendentals=0,
        bytes_accessed=(x.size * x.dtype.itemsize
                        + w_hi.size * w_hi.dtype.itemsize
                        + w_lo.size * w_lo.dtype.itemsize
                        + b_f.size * b_f.dtype.itemsize
                        + B * OUT_DIM * 4),
    )
    out_shape = jax.ShapeDtypeStruct((B, OUT_DIM), jnp.float32)

    tile = _choose_batch_tile(B, tb)
    if tile is None:
        # Small batch: one gridless invocation, all operands VMEM-resident
        # (no pipeline machinery for a one-shot call).
        return pl.pallas_call(
            fused_linear_kernel,
            out_shape=out_shape,
            in_specs=[pl.BlockSpec(memory_space=pltpu.MemorySpace.VMEM)] * 4,
            out_specs=pl.BlockSpec(memory_space=pltpu.MemorySpace.VMEM),
            cost_estimate=cost,
        )(x, w_hi, w_lo, b_f)

    # Streamed path: x / out tiled over the batch ("parallel" -> megacore
    # sharding on v7x); fused weights + bias have a constant index_map, so
    # Pallas keeps them VMEM-resident and does not re-DMA them per step.
    return pl.pallas_call(
        fused_linear_kernel,
        out_shape=out_shape,
        grid=(pl.cdiv(B, tile),),
        in_specs=[
            pl.BlockSpec((tile, IN_DIM), lambda i: (i, 0)),
            pl.BlockSpec((IN_DIM, OUT_DIM), lambda i: (0, 0)),
            pl.BlockSpec((IN_DIM, OUT_DIM), lambda i: (0, 0)),
            pl.BlockSpec((1, OUT_DIM), lambda i: (0, 0)),
        ],
        out_specs=pl.BlockSpec((tile, OUT_DIM), lambda i: (i, 0)),
        compiler_params=pltpu.CompilerParams(
            dimension_semantics=("parallel",),
            vmem_limit_bytes=32 * 1024 * 1024,
        ),
        cost_estimate=cost,
    )(x, w_hi, w_lo, b_f)


def init_params(key):
    """PyTorch nn.Linear default init (U[-1/sqrt(fan_in), +1/sqrt(fan_in)]).
    Weights stored transposed: (in_features, out_features)."""
    k1, k2, k3, k4 = jax.random.split(key, 4)
    bound1 = 1.0 / jnp.sqrt(IN_DIM)
    bound2 = 1.0 / jnp.sqrt(HID_DIM)
    w1 = jax.random.uniform(k1, (IN_DIM, HID_DIM), jnp.float32, -bound1, bound1)
    b1 = jax.random.uniform(k2, (1, HID_DIM), jnp.float32, -bound1, bound1)
    w2 = jax.random.uniform(k3, (HID_DIM, OUT_DIM), jnp.float32, -bound2, bound2)
    b2 = jax.random.uniform(k4, (1, OUT_DIM), jnp.float32, -bound2, bound2)
    return w1, b1, w2, b2


def _reference(x, w1, b1, w2, b2):
    # Two-matmul reference at full f32 precision (matches PyTorch semantics).
    # NOTE: the fused kernel re-associates the reduction (x@(W1@W2)); results
    # differ from the two-matmul form at the ~1e-3 level, not bit-exact.
    h = jnp.dot(x, w1, precision=_HIGHEST) + b1
    return jnp.dot(h, w2, precision=_HIGHEST) + b2


if __name__ == "__main__":
    key = jax.random.PRNGKey(0)
    k_x, k_p = jax.random.split(key)
    w1, b1, w2, b2 = init_params(k_p)
    fused = fuse_params(w1, b1, w2, b2)        # once, at init (hoisted fold)
    jax.block_until_ready(fused)

    TOL_F32 = dict(atol=5e-3, rtol=5e-3)
    TOL_BF16 = dict(atol=2e-2, rtol=2e-2)

    # --- small batch: gridless, fully VMEM-resident path ---
    x_small = jax.random.normal(k_x, (8, IN_DIM), jnp.float32)
    out_small = net_forward(x_small, fused)
    jax.block_until_ready(out_small)
    ref_small = _reference(x_small, w1, b1, w2, b2)
    assert out_small.shape == (8, OUT_DIM)
    assert jnp.allclose(out_small, ref_small, **TOL_F32)

    # --- batch >= 256: streamed grid path, 2 tiles (both v7x TCs engaged) ---
    x_big = jax.random.normal(k_x, (256, IN_DIM), jnp.float32)
    out_big = net_forward(x_big, fused)
    jax.block_until_ready(out_big)
    ref_big = _reference(x_big, w1, b1, w2, b2)
    assert out_big.shape == (256, OUT_DIM)
    assert jnp.allclose(out_big, ref_big, **TOL_F32)

    # --- ragged batch: partial last tile, writeback is masked ---
    x_rag = jax.random.normal(k_x, (320, IN_DIM), jnp.float32)
    out_rag = net_forward(x_rag, fused)
    jax.block_until_ready(out_rag)
    ref_rag = _reference(x_rag, w1, b1, w2, b2)
    assert out_rag.shape == (320, OUT_DIM)
    assert jnp.allclose(out_rag, ref_rag, **TOL_F32)

    # --- bf16-activation path (only when the upstream producer is bf16;
    #     here we cast just to exercise the path) ---
    out_bf16 = net_forward(x_big.astype(jnp.bfloat16), fused)
    jax.block_until_ready(out_bf16)
    assert jnp.allclose(out_bf16, ref_big, **TOL_BF16)

    print("KERNEL_OK")
</pallas_src>

<mosaic_0001>
module attributes {stable_mosaic.version = 11 : i64} {
  func.func @fused_linear_kernel(%arg0: memref<8x768xf32, #tpu.memory_space<vmem>>, %arg1: memref<768x24xbf16, #tpu.memory_space<vmem>>, %arg2: memref<768x24xbf16, #tpu.memory_space<vmem>>, %arg3: memref<1x24xf32, #tpu.memory_space<vmem>>, %arg4: memref<8x24xf32, #tpu.memory_space<vmem>>) attributes {dimension_semantics = [], scalar_prefetch = 0 : i64, scratch_operands = 0 : i64, tpu.core_type = #tpu.core_type<tc>} {
    %c0 = arith.constant 0 : index
    %c0_0 = arith.constant 0 : index
    %0 = vector.load %arg1[%c0, %c0_0] : memref<768x24xbf16, #tpu.memory_space<vmem>>, vector<768x24xbf16>
    %c0_1 = arith.constant 0 : index
    %c0_2 = arith.constant 0 : index
    %1 = vector.load %arg2[%c0_1, %c0_2] : memref<768x24xbf16, #tpu.memory_space<vmem>>, vector<768x24xbf16>
    %c0_3 = arith.constant 0 : index
    %c0_4 = arith.constant 0 : index
    %2 = vector.load %arg0[%c0_3, %c0_4] : memref<8x768xf32, #tpu.memory_space<vmem>>, vector<8x768xf32>
    %3 = arith.truncf %2 : vector<8x768xf32> to vector<8x768xbf16>
    %4 = arith.extf %3 : vector<8x768xbf16> to vector<8x768xf32>
    %5 = arith.subf %2, %4 : vector<8x768xf32>
    %6 = arith.truncf %5 : vector<8x768xf32> to vector<8x768xbf16>
    %cst = arith.constant dense<0.000000e+00> : vector<8x24xf32>
    %7 = tpu.matmul %3, %0, %cst {dimension_numbers = #tpu.dot_dimension_numbers<[1], [0], [0], [1], [0, 0, 1, 1], [], []>} : vector<8x768xbf16>, vector<768x24xbf16>, vector<8x24xf32> -> vector<8x24xf32>
    %cst_5 = arith.constant dense<0.000000e+00> : vector<8x24xf32>
    %8 = tpu.matmul %6, %0, %cst_5 {dimension_numbers = #tpu.dot_dimension_numbers<[1], [0], [0], [1], [0, 0, 1, 1], [], []>} : vector<8x768xbf16>, vector<768x24xbf16>, vector<8x24xf32> -> vector<8x24xf32>
    %9 = arith.addf %7, %8 : vector<8x24xf32>
    %cst_6 = arith.constant dense<0.000000e+00> : vector<8x24xf32>
    %10 = tpu.matmul %3, %1, %cst_6 {dimension_numbers = #tpu.dot_dimension_numbers<[1], [0], [0], [1], [0, 0, 1, 1], [], []>} : vector<8x768xbf16>, vector<768x24xbf16>, vector<8x24xf32> -> vector<8x24xf32>
    %11 = arith.addf %9, %10 : vector<8x24xf32>
    %c0_7 = arith.constant 0 : index
    %c0_8 = arith.constant 0 : index
    %12 = vector.load %arg3[%c0_7, %c0_8] : memref<1x24xf32, #tpu.memory_space<vmem>>, vector<1x24xf32>
    %13 = vector.broadcast %12 : vector<1x24xf32> to vector<8x24xf32>
    %14 = arith.addf %11, %13 : vector<8x24xf32>
    %c0_9 = arith.constant 0 : index
    %c0_10 = arith.constant 0 : index
    %15 = vector.load %arg4[%c0_9, %c0_10] : memref<8x24xf32, #tpu.memory_space<vmem>>, vector<8x24xf32>
    tpu.vector_store %arg4[%c0_9, %c0_10], %14 {strides = array<i32>} : memref<8x24xf32, #tpu.memory_space<vmem>>, vector<8x24xf32>,
    return
  }
}

</mosaic_0001>

<bundles_post_ra>
// kernel: tpu_custom_call.1
= control target key start
LH: loop header
LB: loop body
LE: loop exit
PB: predicated region body
PF: predicated region fallthrough
CT: control target
= control target key end

     0   :  { %s2139_s0 = inlined_call_operand.vmem [shape: f32[8,768], index: 0, kind: input, shape index: {}]   ;;  %s2140_s1 = inlined_call_operand.vmem [shape: bf16[768,24], index: 1, kind: input, shape index: {}]   ;;  %s2141_s2 = inlined_call_operand.vmem [shape: bf16[768,24], index: 2, kind: input, shape index: {}]   ;;  %s2142_s3 = inlined_call_operand.vmem [shape: f32[1,24], index: 3, kind: input, shape index: {}]   ;;  %s2143_s4 = inlined_call_operand.hbm [shape: f32[8,24], index: 4, kind: output, shape index: {}]  }
   0x1   :  { %v1647_v0 = vld [vmem:[%s2140_s1 + $0x40] sm:$0xff]   ;;  %v1670_v4 = vld [vmem:[%s2140_s1 + $0x48] sm:$0xff]   ;;  %v1694_v8 = vld [vmem:[%s2140_s1 + $0x50] sm:$0xff]  }
   0x2   :  { %v1652_v1 = vld [vmem:[%s2140_s1 + $0xc0] sm:$0xff]   ;;  %1299 = vmatprep.subr.bf16.mxu0 %v1647_v0  ;;  %v1676_v5 = vld [vmem:[%s2140_s1 + $0xc8] sm:$0xff]   ;;  %v1700_v9 = vld [vmem:[%s2140_s1 + $0xd0] sm:$0xff]  }
   0x3   :  { %v1658_v2 = vld [vmem:[%s2140_s1] sm:$0xff]   ;;  %1321 = vmatprep.subr.bf16.mxu1 %v1652_v1  ;;  %v1682_v6 = vld [vmem:[%s2140_s1 + $0x8] sm:$0xff]   ;;  %v1706_v10 = vld [vmem:[%s2140_s1 + $0x10] sm:$0xff]  }
   0x4   :  { %v1664_v3 = vld [vmem:[%s2140_s1 + $0x80] sm:$0xff]   ;;  %1300 = vmatpush3.bf16.msra.mxu0 %v1658_v2  ;;  %v1688_v7 = vld [vmem:[%s2140_s1 + $0x88] sm:$0xff]   ;;  %v1712_v11 = vld [vmem:[%s2140_s1 + $0x90] sm:$0xff]  }
   0x5   :  { %1322 = vmatpush3.bf16.msra.mxu1 %v1664_v3  ;;  %1301 = vmatprep.subr.bf16.mxu0 %v1670_v4  ;;  %v1718_v12 = vld [vmem:[%s2140_s1 + $0x58] sm:$0xff]   ;;  %v1742_v16 = vld [vmem:[%s2140_s1 + $0x60] sm:$0xff]   ;;  %v1766_v20 = vld [vmem:[%s2140_s1 + $0x68] sm:$0xff]  }
   0x6   :  { %1323 = vmatprep.subr.bf16.mxu1 %v1676_v5  ;;  %v1724_v13 = vld [vmem:[%s2140_s1 + $0xd8] sm:$0xff]   ;;  %v1748_v17 = vld [vmem:[%s2140_s1 + $0xe0] sm:$0xff]   ;;  %v1772_v21 = vld [vmem:[%s2140_s1 + $0xe8] sm:$0xff]  }
   0x7   :  { %v1730_v14 = vld [vmem:[%s2140_s1 + $0x18] sm:$0xff]   ;;  %v1754_v18 = vld [vmem:[%s2140_s1 + $0x20] sm:$0xff]   ;;  %v1778_v22 = vld [vmem:[%s2140_s1 + $0x28] sm:$0xff]  }
   0x8   :  { %1302 = vmatpush3.bf16.msra.mxu0 %v1682_v6  ;;  %v1736_v15 = vld [vmem:[%s2140_s1 + $0x98] sm:$0xff]   ;;  %v1760_v19 = vld [vmem:[%s2140_s1 + $0xa0] sm:$0xff]   ;;  %v1784_v23 = vld [vmem:[%s2140_s1 + $0xa8] sm:$0xff]  }
   0x9   :  { %1324 = vmatpush3.bf16.msra.mxu1 %v1688_v7  ;;  %1303 = vmatprep.subr.bf16.mxu0 %v1694_v8  ;;  %v1790_v24 = vld [vmem:[%s2140_s1 + $0x70] sm:$0xff]   ;;  %v1814_v28 = vld [vmem:[%s2140_s1 + $0x78] sm:$0xff]   ;;  %v212_v32 = vld [vmem:[%s2139_s0 + $0x8] sm:$0xff] }
   0xa   :  { %1325 = vmatprep.subr.bf16.mxu1 %v1700_v9  ;;  %v1796_v25 = vld [vmem:[%s2140_s1 + $0xf0] sm:$0xff]   ;;  %v1820_v29 = vld [vmem:[%s2140_s1 + $0xf8] sm:$0xff]   ;;  %v211_v34 = vld [vmem:[%s2139_s0] sm:$0xff]  ;;  %v1845_v35 = vpack.c.bf16 %v212_v32, %v212_v32 }
   0xb   :  { %v1802_v26 = vld [vmem:[%s2140_s1 + $0x30] sm:$0xff]   ;;  %v1826_v30 = vld [vmem:[%s2140_s1 + $0x38] sm:$0xff]   ;;  %v1849_v37 = vpack.c.bf16 %v211_v34, %v211_v34  ;;  %v1859_v40 = vld [vmem:[%s2140_s1 + $0x140] sm:$0xff]  }
   0xc   :  { %1304 = vmatpush3.bf16.msra.mxu0 %v1706_v10  ;;  %v1808_v27 = vld [vmem:[%s2140_s1 + $0xb0] sm:$0xff]   ;;  %v1832_v31 = vld [vmem:[%s2140_s1 + $0xb8] sm:$0xff]   ;;  %v224_v41 = vunpack.c.l.bf16 %v1845_v35  ;;  %v1870_v52 = vld [vmem:[%s2140_s1 + $0x100] sm:$0xff]  }
   0xd   :  { %1326 = vmatpush3.bf16.msra.mxu1 %v1712_v11  ;;  %1305 = vmatprep.subr.bf16.mxu0 %v1718_v12  ;;  %v214_v33 = vld [vmem:[%s2139_s0 + $0x18] sm:$0xff]  ;;  %v213_v38 = vld [vmem:[%s2139_s0 + $0x10] sm:$0xff]  ;;  %v223_v43 = vunpack.c.l.bf16 %v1849_v37  ;;  %v1875_v54 = vld [vmem:[%s2140_s1 + $0x148] sm:$0xff]  }
   0xe   :  { %1327 = vmatprep.subr.bf16.mxu1 %v1724_v13  ;;  %v1847_v36 = vpack.c.bf16 %v214_v33, %v214_v33  ;;  %v1854_v39 = vpack.c.bf16 %v213_v38, %v213_v38  ;;  %v230_v45 = vsub.f32 %v212_v32, %v224_v41  ;;  %v1882_v55 = vld [vmem:[%s2140_s1 + $0x108] sm:$0xff]   ;;  %v1534_v56 = vld [vmem:[%s2140_s1 + $0x150] sm:$0xff]   ;;  %v1536_v58 = vld [vmem:[%s2140_s1 + $0x158] sm:$0xff]  }
   0xf   :  { %v229_v47 = vsub.f32 %v211_v34, %v223_v43  ;;  %v1535_v57 = vld [vmem:[%s2140_s1 + $0x110] sm:$0xff]   ;;  %v216_v59 = vld [vmem:[%s2139_s0 + $0x28] sm:$0xff]  ;;  %v1537_v61 = vld [vmem:[%s2140_s1 + $0x118] sm:$0xff]  }
  0x10   :  { %1306 = vmatpush3.bf16.msra.mxu0 %v1730_v14  ;;  %v226_v42 = vunpack.c.l.bf16 %v1847_v36  ;;  %v225_v44 = vunpack.c.l.bf16 %v1854_v39  ;;  %v236_v49 = vpack.c.bf16 %v230_v45, %v230_v45  ;;  %v1902_v60 = vpack.c.bf16 %v216_v59, %v216_v59  ;;  %v1538_v62 = vld [vmem:[%s2140_s1 + $0x160] sm:$0xff]  }
  0x11   :  { %1328 = vmatpush3.bf16.msra.mxu1 %v1736_v15  ;;  %1307 = vmatprep.subr.bf16.mxu0 %v1742_v16  ;;  %v235_v51 = vpack.c.bf16 %v229_v47, %v229_v47 }
  0x12   :  { %1329 = vmatprep.subr.bf16.mxu1 %v1748_v17  ;;  %v232_v46 = vsub.f32 %v214_v33, %v226_v42  ;;  %v231_v48 = vsub.f32 %v213_v38, %v225_v44  ;;  %561 = vmatprep.mubr.bf16.mxu0 %v236_v49  ;;  %v228_v63 = vunpack.c.l.bf16 %v1902_v60  ;;  %v1545_v33 = vld [vmem:[%s2140_s1 + $0x138] sm:$0xff]  }
  0x14   :  { %1308 = vmatpush3.bf16.msra.mxu0 %v1754_v18  ;;  %v238_v50 = vpack.c.bf16 %v232_v46, %v232_v46  ;;  %v237_v53 = vpack.c.bf16 %v231_v48, %v231_v48 }
  0x15   :  { %1330 = vmatpush3.bf16.msra.mxu1 %v1760_v19  ;;  %1309 = vmatprep.subr.bf16.mxu0 %v1766_v20 }
  0x16   :  { %1331 = vmatprep.subr.bf16.mxu1 %v1772_v21  ;;  %601 = vmatprep.mubr.bf16.mxu1 %v238_v50 }
  0x18   :  { %1310 = vmatpush3.bf16.msra.mxu0 %v1778_v22 }
  0x19   :  { %1332 = vmatpush3.bf16.msra.mxu1 %v1784_v23  ;;  %1311 = vmatprep.subr.bf16.mxu0 %v1790_v24 }
  0x1a   :  { %1333 = vmatprep.subr.bf16.mxu1 %v1796_v25 }
  0x1c   :  { %1312 = vmatpush3.bf16.msra.mxu0 %v1802_v26 }
  0x1d   :  { %1334 = vmatpush3.bf16.msra.mxu1 %v1808_v27  ;;  %1313 = vmatprep.subr.bf16.mxu0 %v1814_v28 }
  0x1e   :  { %1335 = vmatprep.subr.bf16.mxu1 %v1820_v29 }
  0x20   :  { %1314 = vmatpush3.bf16.msra.mxu0 %v1826_v30 }
  0x21   :  { %1336 = vmatpush3.bf16.msra.mxu1 %v1832_v31  ;;  %1343 = vmatprep.subr.bf16.mxu0 %v1859_v40 }
  0x22   :  { %1365 = vmatprep.subr.bf16.mxu1 %v1647_v0  ;;  %v1539_v0 = vld [vmem:[%s2140_s1 + $0x120] sm:$0xff]  }
  0x23   :  { %562 = vmatmul.mubr.bf16.vlgmr.msra.gmra.mrb[0].mxu0 %v235_v51 }
  0x24   :  { %602 = vmatmul.mubr.bf16.vlgmr.msra.gmra.mrb[0].mxu1 %v237_v53  ;;  %1344 = vmatpush3.bf16.msra.mxu0 %v1870_v52 }
  0x25   :  { %1366 = vmatpush3.bf16.msra.mxu1 %v1658_v2  ;;  %1345 = vmatprep.subr.bf16.mxu0 %v1875_v54  ;;  %v234_v2 = vsub.f32 %v216_v59, %v228_v63 }
  0x26   :  { %1367 = vmatprep.subr.bf16.mxu1 %v1670_v4  ;;  %681 = vmatprep.mubr.bf16.mxu1 %v1845_v35  ;;  %v215_v4 = vld [vmem:[%s2139_s0 + $0x20] sm:$0xff] }
  0x28   :  { %1346 = vmatpush3.bf16.msra.mxu0 %v1882_v55 }
  0x29   :  { %1368 = vmatpush3.bf16.msra.mxu1 %v1682_v6  ;;  %1347 = vmatprep.subr.bf16.mxu0 %v1534_v56  ;;  %v1540_v6 = vld [vmem:[%s2140_s1 + $0x168] sm:$0xff]  }
  0x2a   :  { %1369 = vmatprep.subr.bf16.mxu1 %v1694_v8  ;;  %v240_v8 = vpack.c.bf16 %v234_v2, %v234_v2 }
  0x2c   :  { %1348 = vmatpush3.bf16.msra.mxu0 %v1535_v57  ;;  %641 = vmatprep.mubr.bf16.mxu0 %v240_v8 }
  0x2d   :  { %1370 = vmatpush3.bf16.msra.mxu1 %v1706_v10  ;;  %1349 = vmatprep.subr.bf16.mxu0 %v1536_v58  ;;  %v1924_v10 = vpack.c.bf16 %v215_v4, %v215_v4 }
  0x2e   :  { %1371 = vmatprep.subr.bf16.mxu1 %v1718_v12  ;;  %v1541_v12 = vld [vmem:[%s2140_s1 + $0x128] sm:$0xff]  }
  0x30   :  { %1350 = vmatpush3.bf16.msra.mxu0 %v1537_v61 }
  0x31   :  { %1372 = vmatpush3.bf16.msra.mxu1 %v1730_v14  ;;  %1351 = vmatprep.subr.bf16.mxu0 %v1538_v62  ;;  %v1542_v14 = vld [vmem:[%s2140_s1 + $0x170] sm:$0xff]  }
  0x32   :  { %1373 = vmatprep.subr.bf16.mxu1 %v1742_v16  ;;  %v227_v16 = vunpack.c.l.bf16 %v1924_v10 }
  0x34   :  { %1352 = vmatpush3.bf16.msra.mxu0 %v1539_v0  ;;  %v233_v32 = vsub.f32 %v215_v4, %v227_v16 }
  0x35   :  { %1374 = vmatpush3.bf16.msra.mxu1 %v1754_v18  ;;  %1353 = vmatprep.subr.bf16.mxu0 %v1540_v6  ;;  %v1543_v18 = vld [vmem:[%s2140_s1 + $0x130] sm:$0xff]  }
  0x36   :  { %1375 = vmatprep.subr.bf16.mxu1 %v1766_v20  ;;  %v1544_v20 = vld [vmem:[%s2140_s1 + $0x178] sm:$0xff]  }
  0x38   :  { %1354 = vmatpush3.bf16.msra.mxu0 %v1541_v12 }
  0x39   :  { %1376 = vmatpush3.bf16.msra.mxu1 %v1778_v22  ;;  %1355 = vmatprep.subr.bf16.mxu0 %v1542_v14  ;;  %v239_v22 = vpack.c.bf16 %v233_v32, %v233_v32 }
  0x3a   :  { %1377 = vmatprep.subr.bf16.mxu1 %v1790_v24 }
  0x3c   :  { %1356 = vmatpush3.bf16.msra.mxu0 %v1543_v18 }
  0x3d   :  { %1378 = vmatpush3.bf16.msra.mxu1 %v1802_v26  ;;  %1357 = vmatprep.subr.bf16.mxu0 %v1544_v20 }
  0x3e   :  { %1379 = vmatprep.subr.bf16.mxu1 %v1814_v28 }
  0x40   :  { %1358 = vmatpush3.bf16.msra.mxu0 %v1545_v33 }
  0x41   :  { %1380 = vmatpush3.bf16.msra.mxu1 %v1826_v30  ;;  %1387 = vmatprep.subr.bf16.mxu0 %v1652_v1 }
  0x42   :  { %1409 = vmatprep.subr.bf16.mxu1 %v1859_v40 }
  0x43   :  { %642 = vmatmul.mubr.bf16.vlgmr.msra.gmra.mrb[4].mxu0 %v239_v22 }
  0x44   :  { %682 = vmatmul.mubr.bf16.vlgmr.msra.gmra.mrb[4].mxu1 %v1849_v37  ;;  %1388 = vmatpush3.bf16.msra.mxu0 %v1664_v3 }
  0x45   :  { %1410 = vmatpush3.bf16.msra.mxu1 %v1870_v52  ;;  %1389 = vmatprep.subr.bf16.mxu0 %v1676_v5 }
  0x46   :  { %1411 = vmatprep.subr.bf16.mxu1 %v1875_v54  ;;  %721 = vmatprep.mubr.bf16.mxu0 %v1847_v36 }
  0x47   :  { %761 = vmatprep.mubr.bf16.mxu1 %v1902_v60 }
  0x48   :  { %1390 = vmatpush3.bf16.msra.mxu0 %v1688_v7 }
  0x49   :  { %1412 = vmatpush3.bf16.msra.mxu1 %v1882_v55  ;;  %1391 = vmatprep.subr.bf16.mxu0 %v1700_v9 }
  0x4a   :  { %1413 = vmatprep.subr.bf16.mxu1 %v1534_v56 }
  0x4c   :  { %1392 = vmatpush3.bf16.msra.mxu0 %v1712_v11 }
  0x4d   :  { %1414 = vmatpush3.bf16.msra.mxu1 %v1535_v57  ;;  %1393 = vmatprep.subr.bf16.mxu0 %v1724_v13 }
  0x4e   :  { %1415 = vmatprep.subr.bf16.mxu1 %v1536_v58 }
  0x50   :  { %1394 = vmatpush3.bf16.msra.mxu0 %v1736_v15 }
  0x51   :  { %1416 = vmatpush3.bf16.msra.mxu1 %v1537_v61  ;;  %1395 = vmatprep.subr.bf16.mxu0 %v1748_v17 }
  0x52   :  { %1417 = vmatprep.subr.bf16.mxu1 %v1538_v62 }
  0x54   :  { %1396 = vmatpush3.bf16.msra.mxu0 %v1760_v19 }
  0x55   :  { %1418 = vmatpush3.bf16.msra.mxu1 %v1539_v0  ;;  %1397 = vmatprep.subr.bf16.mxu0 %v1772_v21 }
  0x56   :  { %1419 = vmatprep.subr.bf16.mxu1 %v1540_v6 }
  0x58   :  { %1398 = vmatpush3.bf16.msra.mxu0 %v1784_v23 }
  0x59   :  { %1420 = vmatpush3.bf16.msra.mxu1 %v1541_v12  ;;  %1399 = vmatprep.subr.bf16.mxu0 %v1796_v25 }
  0x5a   :  { %1421 = vmatprep.subr.bf16.mxu1 %v1542_v14 }
  0x5b   :  { %9 = vsyncpa [#allocation3], 0  ;;  %v1546_v1 = vld [vmem:[%s2141_s2 + $0x40] sm:$0xff]   ;;  %v1550_v9 = vld [vmem:[%s2141_s2 + $0x48] sm:$0xff]   ;;  %s1618_s30 = smov [#allocation2]   ;;  %vm1186_vm0 = vcmask 195584  }
  0x5c   :  { %1400 = vmatpush3.bf16.msra.mxu0 %v1808_v27  ;;  %v1547_v3 = vld [vmem:[%s2141_s2 + $0xc0] sm:$0xff]   ;;  %v1551_v11 = vld [vmem:[%s2141_s2 + $0xc8] sm:$0xff]   ;;  %v1554_v17 = vld [vmem:[%s2141_s2 + $0x50] sm:$0xff]   ;;  %s1194_s5 = sshll.u32 %s1618_s30, 4  ;;  %s1195_s5 = int_to_ptr.vmem [resolvable:$true] %s1194_s5 }
  0x5d   :  { %1422 = vmatpush3.bf16.msra.mxu1 %v1543_v18  ;;  %1401 = vmatprep.subr.bf16.mxu0 %v1820_v29  ;;  %v1548_v5 = vld [vmem:[%s2141_s2] sm:$0xff]   ;;  %v1552_v13 = vld [vmem:[%s2141_s2 + $0x8] sm:$0xff]   ;;  %v1555_v19 = vld [vmem:[%s2141_s2 + $0xd0] sm:$0xff]   ;;  %s1594_s6 = scalar_lea.vmem %s1195_s5, 128  ;;  %p1599_p1 = scmp.lt.s32.totalorder %s1195_s5, %s1195_s5 }
  0x5e   :  { %1423 = vmatprep.subr.bf16.mxu1 %v1544_v20  ;;  %v1549_v7 = vld [vmem:[%s2141_s2 + $0x80] sm:$0xff]   ;;  %v1553_v15 = vld [vmem:[%s2141_s2 + $0x88] sm:$0xff]   ;;  %v1556_v21 = vld [vmem:[%s2141_s2 + $0x10] sm:$0xff]   ;;  %p1595_p0 = scmp.ne.s32.totalorder %s1195_s5, %s1594_s6  ;;  %p1600_p2 = scmp.lt.s32.totalorder %s1594_s6, %s1594_s6 }
  0x5f   :  { %v1557_v23 = vld [vmem:[%s2141_s2 + $0x90] sm:$0xff]   ;;  %v1558_v24 = vld [vmem:[%s2141_s2 + $0x58] sm:$0xff]   ;;  %v1562_v28 = vld [vmem:[%s2141_s2 + $0x60] sm:$0xff]  }
  0x60   :  { %1402 = vmatpush3.bf16.msra.mxu0 %v1832_v31  ;;  %v1559_v25 = vld [vmem:[%s2141_s2 + $0xd8] sm:$0xff]   ;;  %v1563_v29 = vld [vmem:[%s2141_s2 + $0xe0] sm:$0xff]   ;;  %v1566_v34 = vld [vmem:[%s2141_s2 + $0x68] sm:$0xff]   ;;  %p1601_p3 = por %p1600_p2, %p1599_p1 }
  0x61   :  { %1424 = vmatpush3.bf16.msra.mxu1 %v1545_v33  ;;  %1431 = vmatprep.subr.bf16.mxu0 %v1546_v1  ;;  %v1560_v26 = vld [vmem:[%s2141_s2 + $0x18] sm:$0xff]   ;;  %v1564_v30 = vld [vmem:[%s2141_s2 + $0x20] sm:$0xff]   ;;  %v1569_v38 = vld [vmem:[%s2141_s2 + $0xa8] sm:$0xff]  }
  0x62   :  { %1453 = vmatprep.subr.bf16.mxu1 %v1547_v3  ;;  %v1561_v27 = vld [vmem:[%s2141_s2 + $0x98] sm:$0xff]   ;;  %v1565_v31 = vld [vmem:[%s2141_s2 + $0xa0] sm:$0xff]   ;;  %v1570_v40 = vld [vmem:[%s2141_s2 + $0x70] sm:$0xff]   ;;  %p1602_p4 = pnand %p1601_p3, %p1595_p0 }
  0x63   :  { %722 = vmatmul.mubr.bf16.vlgmr.msra.gmra.mrb[8].mxu0 %v1854_v39  ;;  %v1571_v41 = vld [vmem:[%s2141_s2 + $0xf0] sm:$0xff]   ;;  %v1574_v44 = vld [vmem:[%s2141_s2 + $0x78] sm:$0xff]   ;;  %v1578_v48 = vld [vmem:[%s2141_s2 + $0x140] sm:$0xff]  }
  0x64   :  { %762 = vmatmul.mubr.bf16.vlgmr.msra.gmra.mrb[8].mxu1 %v1924_v10  ;;  %1432 = vmatpush3.bf16.msra.mxu0 %v1548_v5  ;;  %v1572_v42 = vld [vmem:[%s2141_s2 + $0x30] sm:$0xff]   ;;  %v1575_v45 = vld [vmem:[%s2141_s2 + $0xf8] sm:$0xff]   ;;  %v1579_v49 = vld [vmem:[%s2141_s2 + $0x100] sm:$0xff]  }
  0x65   :  { %1454 = vmatpush3.bf16.msra.mxu1 %v1549_v7  ;;  %1433 = vmatprep.subr.bf16.mxu0 %v1550_v9  ;;  %v1573_v43 = vld [vmem:[%s2141_s2 + $0xb0] sm:$0xff]   ;;  %v1576_v46 = vld [vmem:[%s2141_s2 + $0x38] sm:$0xff]   ;;  %v1580_v50 = vld [vmem:[%s2141_s2 + $0x148] sm:$0xff]  }
  0x66   :  { %1455 = vmatprep.subr.bf16.mxu1 %v1551_v11  ;;  %1089 = vmatprep.mubr.bf16.mxu0 %v1845_v35  ;;  %v1567_v35 = vld [vmem:[%s2141_s2 + $0xe8] sm:$0xff]   ;;  %v1577_v47 = vld [vmem:[%s2141_s2 + $0xb8] sm:$0xff]   ;;  %v1582_v52 = vld [vmem:[%s2141_s2 + $0x150] sm:$0xff]  }
  0x67   :  { %1129 = vmatprep.mubr.bf16.mxu1 %v1847_v36  ;;  %v1568_v36 = vld [vmem:[%s2141_s2 + $0x28] sm:$0xff]   ;;  %v1583_v53 = vld [vmem:[%s2141_s2 + $0x110] sm:$0xff]   ;;  %v1586_v54 = vld [vmem:[%s2141_s2 + $0x160] sm:$0xff]  }
  0x68   :  { %1434 = vmatpush3.bf16.msra.mxu0 %v1552_v13  ;;  %v1581_v51 = vld [vmem:[%s2141_s2 + $0x108] sm:$0xff]   ;;  %v1587_v55 = vld [vmem:[%s2141_s2 + $0x120] sm:$0xff]   ;;  %v1590_v58 = vld [vmem:[%s2141_s2 + $0x170] sm:$0xff]  }
  0x69   :  { %1456 = vmatpush3.bf16.msra.mxu1 %v1553_v15  ;;  %1435 = vmatprep.subr.bf16.mxu0 %v1554_v17  ;;  %v1588_v56 = vld [vmem:[%s2141_s2 + $0x168] sm:$0xff]   ;;  %v1591_v59 = vld [vmem:[%s2141_s2 + $0x130] sm:$0xff]   ;;  %v1593_v61 = vld [vmem:[%s2141_s2 + $0x138] sm:$0xff]  }
  0x6a   :  { %1457 = vmatprep.subr.bf16.mxu1 %v1555_v19  ;;  %v1589_v57 = vld [vmem:[%s2141_s2 + $0x128] sm:$0xff]  }
  0x6c   :  { %1436 = vmatpush3.bf16.msra.mxu0 %v1556_v21 }
  0x6d   :  { %1458 = vmatpush3.bf16.msra.mxu1 %v1557_v23  ;;  %1437 = vmatprep.subr.bf16.mxu0 %v1558_v24 }
  0x6e   :  { %1459 = vmatprep.subr.bf16.mxu1 %v1559_v25 }
  0x70   :  { %1438 = vmatpush3.bf16.msra.mxu0 %v1560_v26 }
  0x71   :  { %1460 = vmatpush3.bf16.msra.mxu1 %v1561_v27  ;;  %1439 = vmatprep.subr.bf16.mxu0 %v1562_v28 }
  0x72   :  { %1461 = vmatprep.subr.bf16.mxu1 %v1563_v29 }
  0x74   :  { %1440 = vmatpush3.bf16.msra.mxu0 %v1564_v30 }
  0x75   :  { %1462 = vmatpush3.bf16.msra.mxu1 %v1565_v31  ;;  %1441 = vmatprep.subr.bf16.mxu0 %v1566_v34 }
  0x76   :  { %1463 = vmatprep.subr.bf16.mxu1 %v1567_v35 }
  0x78   :  { %1442 = vmatpush3.bf16.msra.mxu0 %v1568_v36 }
  0x79   :  { %1464 = vmatpush3.bf16.msra.mxu1 %v1569_v38  ;;  %1443 = vmatprep.subr.bf16.mxu0 %v1570_v40 }
  0x7a   :  { %1465 = vmatprep.subr.bf16.mxu1 %v1571_v41 }
  0x7c   :  { %1444 = vmatpush3.bf16.msra.mxu0 %v1572_v42 }
  0x7d   :  { %1466 = vmatpush3.bf16.msra.mxu1 %v1573_v43  ;;  %1445 = vmatprep.subr.bf16.mxu0 %v1574_v44 }
  0x7e   :  { %1467 = vmatprep.subr.bf16.mxu1 %v1575_v45 }
  0x80   :  { %1446 = vmatpush3.bf16.msra.mxu0 %v1576_v46 }
  0x81   :  { %1468 = vmatpush3.bf16.msra.mxu1 %v1577_v47  ;;  %1475 = vmatprep.subr.bf16.mxu0 %v1578_v48 }
  0x83   :  { %1090 = vmatmul.mubr.bf16.vlgmr.msra.gmra.mrb[12].mxu0 %v1849_v37  ;;  %v1584_v37 = vld [vmem:[%s2141_s2 + $0x158] sm:$0xff]  }
  0x84   :  { %1130 = vmatmul.mubr.bf16.vlgmr.msra.gmra.mrb[12].mxu1 %v1854_v39  ;;  %1476 = vmatpush3.bf16.msra.mxu0 %v1579_v49  ;;  %v1585_v39 = vld [vmem:[%s2141_s2 + $0x118] sm:$0xff]  }
  0x85   :  { %1169 = vmatprep.mubr.bf16.mxu0 %v1902_v60  ;;  %1477 = vmatprep.subr.bf16.mxu0 %v1580_v50  ;;  %v1592_v60 = vld [vmem:[%s2141_s2 + $0x178] sm:$0xff]  }
  0x88   :  { %1478 = vmatpush3.bf16.msra.mxu0 %v1581_v51 }
  0x89   :  { %1479 = vmatprep.subr.bf16.mxu0 %v1582_v52  ;;  %v1298_v52 = vld [vmem:[%s2142_s3] ss:$0 sm:$0xff] }
  0x8c   :  { %1480 = vmatpush3.bf16.msra.mxu0 %v1583_v53 }
  0x8d   :  { %1481 = vmatprep.subr.bf16.mxu0 %v1584_v37 }
  0x90   :  { %1482 = vmatpush3.bf16.msra.mxu0 %v1585_v39 }
  0x91   :  { %1483 = vmatprep.subr.bf16.mxu0 %v1586_v54 }
  0x94   :  { %1484 = vmatpush3.bf16.msra.mxu0 %v1587_v55 }
  0x95   :  { %1485 = vmatprep.subr.bf16.mxu0 %v1588_v56 }
  0x98   :  { %1486 = vmatpush3.bf16.msra.mxu0 %v1589_v57 }
  0x99   :  { %1487 = vmatprep.subr.bf16.mxu0 %v1590_v58 }
  0x9c   :  { %1488 = vmatpush3.bf16.msra.mxu0 %v1591_v59 }
  0x9d   :  { %1489 = vmatprep.subr.bf16.mxu0 %v1592_v60 }
  0xa0   :  { %1490 = vmatpush3.bf16.msra.mxu0 %v1593_v61 }
  0xa3   :  { %1170 = vmatmul.mubr.bf16.vlgmr.msra.gmra.mrb[16].mxu0 %v1924_v10 }
  0xf6   :  { %v1315_v62 = vpop.f32.mrb[0].mxu0 }
  0xf7   :  { %v1337_v63 = vpop.f32.mrb[0].mxu1  ;;  %v1316_v0 = vpop.f32.mrb[1].mxu0 }
  0xf8   :  { %v1338_v2 = vpop.f32.mrb[1].mxu1  ;;  %v1317_v4 = vadd.f32 %v1316_v0, %v1315_v62  ;;  %v1318_v8 = vpop.f32.mrb[2].mxu0 }
  0xf9   :  { %v1339_v6 = vadd.f32 %v1338_v2, %v1337_v63  ;;  %v1340_v12 = vpop.f32.mrb[2].mxu1  ;;  %v1319_v14 = vpop.f32.mrb[3].mxu0 }
  0xfa   :  { %v1341_v16 = vpop.f32.mrb[3].mxu1 }
  0xfb   :  { %v604_v18 = vadd.f32 %v1339_v6, %v1317_v4 }
 0x116   :  { %v1359_v20 = vpop.f32.mrb[4].mxu0 }
 0x117   :  { %v1381_v32 = vpop.f32.mrb[4].mxu1  ;;  %v1360_v33 = vpop.f32.mrb[5].mxu0 }
 0x118   :  { %v1382_v22 = vpop.f32.mrb[5].mxu1  ;;  %v1361_v1 = vadd.f32 %v1360_v33, %v1359_v20  ;;  %v1362_v3 = vpop.f32.mrb[6].mxu0 }
 0x119   :  { %v1383_v5 = vadd.f32 %v1382_v22, %v1381_v32  ;;  %v1384_v7 = vpop.f32.mrb[6].mxu1  ;;  %v1363_v10 = vpop.f32.mrb[7].mxu0 }
 0x11a   :  { %v1385_v9 = vpop.f32.mrb[7].mxu1  ;;  %v644_v11 = vadd.f32 %v1361_v1, %v604_v18 }
 0x11c   :  { %v684_v13 = vadd.f32 %v1383_v5, %v644_v11 }
 0x136   :  { %v1403_v15 = vpop.f32.mrb[8].mxu0 }
 0x137   :  { %v1425_v17 = vpop.f32.mrb[8].mxu1  ;;  %v1404_v19 = vpop.f32.mrb[9].mxu0 }
 0x138   :  { %v1426_v21 = vpop.f32.mrb[9].mxu1  ;;  %v1405_v23 = vadd.f32 %v1404_v19, %v1403_v15  ;;  %v1406_v24 = vpop.f32.mrb[10].mxu0 }
 0x139   :  { %v1427_v25 = vadd.f32 %v1426_v21, %v1425_v17  ;;  %v1428_v26 = vpop.f32.mrb[10].mxu1  ;;  %v1407_v27 = vpop.f32.mrb[11].mxu0 }
 0x13a   :  { %v1429_v28 = vpop.f32.mrb[11].mxu1  ;;  %v724_v29 = vadd.f32 %v1405_v23, %v684_v13 }
 0x13c   :  { %v764_v30 = vadd.f32 %v1427_v25, %v724_v29 }
 0x156   :  { %v1447_v31 = vpop.f32.mrb[12].mxu0 }
 0x157   :  { %v1469_v34 = vpop.f32.mrb[12].mxu1  ;;  %v1448_v35 = vpop.f32.mrb[13].mxu0 }
 0x158   :  { %v1470_v36 = vpop.f32.mrb[13].mxu1  ;;  %v1449_v38 = vadd.f32 %v1448_v35, %v1447_v31  ;;  %v1450_v41 = vpop.f32.mrb[14].mxu0 }
 0x159   :  { %v1471_v40 = vadd.f32 %v1470_v36, %v1469_v34  ;;  %v1472_v42 = vpop.f32.mrb[14].mxu1  ;;  %v1451_v43 = vpop.f32.mrb[15].mxu0 }
 0x15a   :  { %v1473_v44 = vpop.f32.mrb[15].mxu1 }
 0x15b   :  { %v1132_v45 = vadd.f32 %v1471_v40, %v1449_v38 }
 0x176   :  { %v1491_v46 = vpop.f32.mrb[16].mxu0 }
 0x177   :  { %v1492_v47 = vpop.f32.mrb[17].mxu0 }
 0x178   :  { %v1493_v48 = vadd.f32 %v1492_v47, %v1491_v46  ;;  %v1494_v49 = vpop.f32.mrb[18].mxu0 }
 0x179   :  { %v1495_v50 = vpop.f32.mrb[19].mxu0 }
 0x17a   :  { %v1172_v51 = vadd.f32 %v1493_v48, %v1132_v45 }
 0x17c   :  { %v1177_v53 = vadd.f32 %v1172_v51, %v764_v30 }
 0x17e   :  { %v1185_v37 = vadd.f32 %v1298_v52, %v1177_v53 }
 0x180   :  { %1187 = vst.msk [vmem:[#allocation2] sm:$0xff] %vm1186_vm0, %v1185_v37 }
 0x181   :  { %1605 = shalt.err (!%p1602_p4)
}
 0x182   :  { %s1606_s9 = scalar_lea.hbm %s2143_s4, 128 }
 0x183   :  { %p1607_p5 = scmp.ne.s32.totalorder %s2143_s4, %s1606_s9  ;;  %p1610_p6 = scmp.lt.u32.totalorder %s1606_s9, %s2143_s4 }
 0x185   :  { %p1612_p7 = pnand %p1610_p6, %p1607_p5 }
 0x187   :  { %1615 = shalt.err (!%p1612_p7)
}
 0x188   :  { %1197 = dma.vmem_to_hbm [thread:$0]  %s1195_s5, 128, %s2143_s4, [#allocation3]  }
 0x189   :  { %1616 = dma.done.wait [#allocation3], 128  }
 0x18a   :  { %1617 = vsyncadd [#allocation3], 4294967168 }
 0x18b   :  { %1201 = vsyncpa [#allocation3], 1 }

</bundles_post_ra>
